<compile_context>
chip_gen: v6e
topology: v6e:2x2x1
jax: 0.10.0
libtpu: 0.0.40
codegen_flags: <defaults>
</compile_context>

<pallas_src>
import jax
import jax.numpy as jnp
from jax.experimental import pallas as pl
from jax.experimental.pallas import tpu as pltpu


_TARGET_BLOCK_BYTES = 1 << 20  # ~1 MiB per streamed operand per grid step.


def _contrastive_kernel(xq_ref, xk_ref, p_ref, q_ref, k_ref):
    # xq_ref / xk_ref : (block_b, 1, row_tile, L)   (pair axis kept as size 1)
    # p_ref           : (row_tile, 4)  columns = [scale_q, bias_q, scale_k, bias_k]
    # q_ref / k_ref   : (block_b, row_tile, L)
    p = p_ref[...]
    sq = p[:, 0:1]
    bq = p[:, 1:2]
    sk = p[:, 2:3]
    bk = p[:, 3:4]

    xq = xq_ref[...][:, 0].astype(jnp.float32)
    xk = xk_ref[...][:, 0].astype(jnp.float32)

    q_ref[...] = (xq * sq + bq).astype(q_ref.dtype)
    k_ref[...] = (xk * sk + bk).astype(k_ref.dtype)


def _largest_divisor(n, cap, multiple_of=1):
    best = None
    for d in range(1, n + 1):
        if n % d == 0 and d <= cap and d % multiple_of == 0:
            best = d
    return best


def transform_contrastive(image, scale_q, bias_q, scale_k, bias_k):
    """image: [B, 2, C, H, W]. Returns (q, k), each [B, C, H, W] (image dtype)."""
    B, two, C, H, W = image.shape
    assert two == 2, "expected a stacked (query, key) image pair on axis 1"
    HW = H * W
    itemsize = jnp.dtype(image.dtype).itemsize

    # Lane-dense re-layout when HW is 128-divisible; otherwise fall back to the
    # (C, HW) layout (still correct, lanes may be partially masked).
    L = 128 if HW % 128 == 0 else HW
    rows_per_ch = HW // L
    R = C * rows_per_ch

    # Contiguous (free) reshape. The pair axis is selected in the index_maps,
    # so no host-side slicing / extra HBM pass happens.
    x = image.reshape(B, 2, R, L)

    # Packed per-row affine parameters: one small (R, 4) f32 VMEM operand.
    def _rows(v):
        return jnp.repeat(v.reshape(C).astype(jnp.float32), rows_per_ch)

    params = jnp.stack(
        [_rows(scale_q), _rows(bias_q), _rows(scale_k), _rows(bias_k)], axis=1)

    # --- Tile sizing -------------------------------------------------------
    bytes_per_row = L * itemsize
    if R * bytes_per_row <= _TARGET_BLOCK_BYTES:
        row_tile = R
    else:
        cap_rows = max(8, _TARGET_BLOCK_BYTES // bytes_per_row)
        row_tile = _largest_divisor(R, cap_rows, multiple_of=8) or R

    if row_tile == R and B > 1:
        per_image = R * bytes_per_row
        cap_b = max(1, _TARGET_BLOCK_BYTES // per_image)
        cap_b = min(cap_b, max(1, B // 2))  # keep >= 2 parallel steps (v7x megacore)
        block_b = _largest_divisor(B, cap_b) or 1
    else:
        block_b = 1

    grid = (B // block_b, R // row_tile)

    in_spec_q = pl.BlockSpec((block_b, 1, row_tile, L), lambda b, r: (b, 0, r, 0))
    in_spec_k = pl.BlockSpec((block_b, 1, row_tile, L), lambda b, r: (b, 1, r, 0))
    p_spec = pl.BlockSpec((row_tile, 4), lambda b, r: (r, 0))
    out_spec = pl.BlockSpec((block_b, row_tile, L), lambda b, r: (b, r, 0))

    q, k = pl.pallas_call(
        _contrastive_kernel,
        out_shape=(
            jax.ShapeDtypeStruct((B, R, L), image.dtype),
            jax.ShapeDtypeStruct((B, R, L), image.dtype),
        ),
        grid_spec=pltpu.PrefetchScalarGridSpec(
            num_scalar_prefetch=0,
            grid=grid,
            in_specs=[in_spec_q, in_spec_k, p_spec],
            out_specs=[out_spec, out_spec],
        ),
        compiler_params=pltpu.CompilerParams(
            dimension_semantics=("parallel", "parallel"),
            vmem_limit_bytes=32 * 1024 * 1024,
        ),
    )(x, x, params)

    return q.reshape(B, C, H, W), k.reshape(B, C, H, W)


if __name__ == "__main__":
    B, C, H, W = 2, 4, 16, 16

    key = jax.random.PRNGKey(0)
    image = jax.random.normal(key, (B, 2, C, H, W), dtype=jnp.float32)

    # Deterministic per-channel transform parameters (synthetic "Normalize").
    scale_q = 1.0 / (0.2 + 0.05 * jnp.arange(C, dtype=jnp.float32))
    bias_q = -0.45 - 0.01 * jnp.arange(C, dtype=jnp.float32)
    scale_k = 1.0 / (0.25 + 0.04 * jnp.arange(C, dtype=jnp.float32))
    bias_k = -0.40 - 0.02 * jnp.arange(C, dtype=jnp.float32)

    q, k = transform_contrastive(image, scale_q, bias_q, scale_k, bias_k)
    jax.block_until_ready((q, k))

    # Pure-JAX reference check of the forward semantics.
    ref_q = image[:, 0] * scale_q[None, :, None, None] + bias_q[None, :, None, None]
    ref_k = image[:, 1] * scale_k[None, :, None, None] + bias_k[None, :, None, None]
    assert q.shape == (B, C, H, W) and k.shape == (B, C, H, W)
    assert jnp.allclose(q, ref_q, atol=1e-6, rtol=1e-6)
    assert jnp.allclose(k, ref_k, atol=1e-6, rtol=1e-6)

    print("KERNEL_OK")
</pallas_src>

<mosaic_0001>
module attributes {stable_mosaic.version = 11 : i64} {
  func.func @_contrastive_kernel(%arg0: i32, %arg1: i32, %arg2: memref<1x1x8x128xf32, #tpu.memory_space<vmem>>, %arg3: memref<1x1x8x128xf32, #tpu.memory_space<vmem>>, %arg4: memref<8x4xf32, #tpu.memory_space<vmem>>, %arg5: memref<1x8x128xf32, #tpu.memory_space<vmem>>, %arg6: memref<1x8x128xf32, #tpu.memory_space<vmem>>) attributes {dimension_semantics = [#tpu.dimension_semantics<parallel>, #tpu.dimension_semantics<parallel>], iteration_bounds = array<i64: 2, 1>, scalar_prefetch = 0 : i64, scratch_operands = 0 : i64, tpu.core_type = #tpu.core_type<tc>, window_params = [{transform_indices = @transform_0, window_bounds = array<i64: 1, 1, 8, 128>}, {transform_indices = @transform_1, window_bounds = array<i64: 1, 1, 8, 128>}, {transform_indices = @transform_2, window_bounds = array<i64: 8, 4>}, {transform_indices = @transform_3, window_bounds = array<i64: 1, 8, 128>}, {transform_indices = @transform_4, window_bounds = array<i64: 1, 8, 128>}]} {
    %c0 = arith.constant 0 : index
    %c0_0 = arith.constant 0 : index
    %0 = vector.load %arg4[%c0, %c0_0] : memref<8x4xf32, #tpu.memory_space<vmem>>, vector<8x4xf32>
    %1 = vector.extract_strided_slice %0 {offsets = [0, 0], sizes = [8, 1], strides = [1, 1]} : vector<8x4xf32> to vector<8x1xf32>
    %2 = vector.extract_strided_slice %0 {offsets = [0, 1], sizes = [8, 1], strides = [1, 1]} : vector<8x4xf32> to vector<8x1xf32>
    %3 = vector.extract_strided_slice %0 {offsets = [0, 2], sizes = [8, 1], strides = [1, 1]} : vector<8x4xf32> to vector<8x1xf32>
    %4 = vector.extract_strided_slice %0 {offsets = [0, 3], sizes = [8, 1], strides = [1, 1]} : vector<8x4xf32> to vector<8x1xf32>
    %c0_1 = arith.constant 0 : index
    %c0_2 = arith.constant 0 : index
    %c0_3 = arith.constant 0 : index
    %c0_4 = arith.constant 0 : index
    %5 = vector.load %arg2[%c0_1, %c0_2, %c0_3, %c0_4] : memref<1x1x8x128xf32, #tpu.memory_space<vmem>>, vector<1x1x8x128xf32>
    %6 = vector.shape_cast %5 : vector<1x1x8x128xf32> to vector<1x8x128xf32>
    %c0_5 = arith.constant 0 : index
    %c0_6 = arith.constant 0 : index
    %c0_7 = arith.constant 0 : index
    %c0_8 = arith.constant 0 : index
    %7 = vector.load %arg3[%c0_5, %c0_6, %c0_7, %c0_8] : memref<1x1x8x128xf32, #tpu.memory_space<vmem>>, vector<1x1x8x128xf32>
    %8 = vector.shape_cast %7 : vector<1x1x8x128xf32> to vector<1x8x128xf32>
    %9 = vector.shape_cast %1 : vector<8x1xf32> to vector<1x8x1xf32>
    %10 = vector.broadcast %9 : vector<1x8x1xf32> to vector<1x8x128xf32>
    %11 = arith.mulf %6, %10 : vector<1x8x128xf32>
    %12 = vector.shape_cast %2 : vector<8x1xf32> to vector<1x8x1xf32>
    %13 = vector.broadcast %12 : vector<1x8x1xf32> to vector<1x8x128xf32>
    %14 = arith.addf %11, %13 : vector<1x8x128xf32>
    %c0_9 = arith.constant 0 : index
    %c0_10 = arith.constant 0 : index
    %c0_11 = arith.constant 0 : index
    %15 = vector.load %arg5[%c0_9, %c0_10, %c0_11] : memref<1x8x128xf32, #tpu.memory_space<vmem>>, vector<1x8x128xf32>
    tpu.vector_store %arg5[%c0_9, %c0_10, %c0_11], %14 {strides = array<i32>} : memref<1x8x128xf32, #tpu.memory_space<vmem>>, vector<1x8x128xf32>,
    %16 = vector.shape_cast %3 : vector<8x1xf32> to vector<1x8x1xf32>
    %17 = vector.broadcast %16 : vector<1x8x1xf32> to vector<1x8x128xf32>
    %18 = arith.mulf %8, %17 : vector<1x8x128xf32>
    %19 = vector.shape_cast %4 : vector<8x1xf32> to vector<1x8x1xf32>
    %20 = vector.broadcast %19 : vector<1x8x1xf32> to vector<1x8x128xf32>
    %21 = arith.addf %18, %20 : vector<1x8x128xf32>
    %c0_12 = arith.constant 0 : index
    %c0_13 = arith.constant 0 : index
    %c0_14 = arith.constant 0 : index
    %22 = vector.load %arg6[%c0_12, %c0_13, %c0_14] : memref<1x8x128xf32, #tpu.memory_space<vmem>>, vector<1x8x128xf32>
    tpu.vector_store %arg6[%c0_12, %c0_13, %c0_14], %21 {strides = array<i32>} : memref<1x8x128xf32, #tpu.memory_space<vmem>>, vector<1x8x128xf32>,
    return
  }
  func.func @transform_0(%arg0: i32, %arg1: i32) -> (i32, i32, i32, i32) {
    %c0_i32 = arith.constant 0 : i32
    %c0_i32_0 = arith.constant 0 : i32
    %c0_i32_1 = arith.constant 0 : i32
    return %arg0, %c0_i32, %arg1, %c0_i32_0 : i32, i32, i32, i32
  }
  func.func @transform_1(%arg0: i32, %arg1: i32) -> (i32, i32, i32, i32) {
    %c1_i32 = arith.constant 1 : i32
    %c0_i32 = arith.constant 0 : i32
    %c0_i32_0 = arith.constant 0 : i32
    return %arg0, %c1_i32, %arg1, %c0_i32 : i32, i32, i32, i32
  }
  func.func @transform_2(%arg0: i32, %arg1: i32) -> (i32, i32) {
    %c0_i32 = arith.constant 0 : i32
    %c0_i32_0 = arith.constant 0 : i32
    return %arg1, %c0_i32 : i32, i32
  }
  func.func @transform_3(%arg0: i32, %arg1: i32) -> (i32, i32, i32) {
    %c0_i32 = arith.constant 0 : i32
    %c0_i32_0 = arith.constant 0 : i32
    return %arg0, %arg1, %c0_i32 : i32, i32, i32
  }
  func.func @transform_4(%arg0: i32, %arg1: i32) -> (i32, i32, i32) {
    %c0_i32 = arith.constant 0 : i32
    %c0_i32_0 = arith.constant 0 : i32
    return %arg0, %arg1, %c0_i32 : i32, i32, i32
  }
}

</mosaic_0001>

<bundles_post_ra>
// kernel: tpu_custom_call.1
= control target key start
LH: loop header
LB: loop body
LE: loop exit
PB: predicated region body
PF: predicated region fallthrough
CT: control target
= control target key end

     0   :  { %s1038_s0 = inlined_call_operand.hbm [shape: f32[2,2,8,128], index: 0, kind: input, shape index: {}]   ;;  %s1039_s1 = inlined_call_operand.hbm [shape: f32[2,2,8,128], index: 1, kind: input, shape index: {}]   ;;  %s1040_s2 = inlined_call_operand.vmem [shape: f32[8,4], index: 2, kind: input, shape index: {}]   ;;  %s1041_s3 = inlined_call_operand.hbm [shape: f32[2,8,128], index: 3, kind: output, shape index: {0}]   ;;  %s1042_s4 = inlined_call_operand.hbm [shape: f32[2,8,128], index: 4, kind: output, shape index: {1}]  }
   0x1   :  { %1043 = sst [smem:[#allocation14_spill]] %s1038_s0 }
   0x2   :  { %10 = vsyncpa [#allocation3], 0 }
   0x3   :  { %12 = vsyncpa [#allocation3 + $0x1], 0 }
   0x4   :  { %13 = vsyncpa [#allocation6], 0 }
   0x5   :  { %15 = vsyncpa [#allocation6 + $0x1], 0 }
   0x6   :  { %16 = vsyncpa [#allocation4], 0 }
   0x7   :  { %18 = vsyncpa [#allocation4 + $0x1], 0 }
   0x8   :  { %19 = vsyncpa [#allocation9], 0 }
   0x9   :  { %21 = vsyncpa [#allocation9 + $0x1], 0  ;;  %s829_s15 = smov 0   ;;  %s831_s16 = smov 0  }
   0xa   :  { %s833_s17 = smov 0   ;;  %s835_s18 = smov 0  }
   0xb   :  { %s837_s19 = smov 0   ;;  %s839_s20 = smov 0  }
   0xc LB: > { %s518_s21 = sadd.s32 4294967295, %s794_s20   ;;  %s519_s22 = sadd.s32 4294967294, %s794_s20   ;;  %s794_s20 = sphi %s839_s20, %s27_s20   ;;  %s790_s19 = sphi %s837_s19, %s1056_s19   ;;  %s786_s18 = sphi %s835_s18, %s1055_s18   ;;  %s782_s17 = sphi %s833_s17, %s1054_s17   ;;  %s778_s16 = sphi %s831_s16, %s1053_s16   ;;  %s774_s15 = sphi %s829_s15, %s1052_s15  }
   0xd   : > { %s39_s23 = sadd.s32 1, %s790_s19  ;;  %s48_s24 = sadd.s32 1, %s782_s17 }
   0xe   : > { %p41_p0 = scmp.ge.s32.totalorder %s39_s23, 2  ;;  %p55_p1 = scmp.ne.s32.totalorder %s782_s17, %s778_s16 }
   0xf   : > { %p56_p2 = scmp.eq.s32.totalorder %s794_s20, 0  ;;  %p61_p3 = scmp.ne.s32.totalorder %s778_s16, %s774_s15 }
  0x10   : > { %s1058_s23 = smov (%p41_p0, %s39_s23), 0  ;;  %p62_p5 = scmp.eq.s32.totalorder %s518_s21, 0 }
  0x11   : > { %p870_p4 = por %p56_p2, %p55_p1  ;;  %s43_s26 = ssub.s32 %s790_s19, %s1058_s23 }
  0x12   : > { %p141_p6 = scmp.eq.s32.totalorder %s518_s21, 1  ;;  %p46_p7 = scmp.eq.s32.totalorder %s43_s26, 0 }
  0x13   : > { %p876_p8 = por %p62_p5, %p61_p3  ;;  %p147_p10 = scmp.eq.s32.totalorder %s519_s22, 1 }
  0x14   : > { %p880_p9 = por %p141_p6, %p55_p1  ;;  %p564_p13 = scmp.lt.s32.totalorder %s794_s20, 2 }
  0x15   : > { %s885_s29 = scalar_select %p46_p7, %s782_s17, %s48_s24  }
  0x16   : > { %p887_p11 = por %p147_p10, %p61_p3  ;;  %s894_s5 = sand.u32 1, %s782_s17  }
  0x17   : > { %s523_s6 = sshll.u32 %s894_s5, 3  ;;  %s540_s7 = sshll.u32 %s790_s19, 8 }
  0x18   : > { %s1048_s0 = sld [smem:[#allocation14_spill]]  ;;  %s206_s11 = scalar_lea.vmem [#allocation2], %s523_s6 }
  0x19   : > { %s215_s12 = sshll.u32 %s206_s11, 4  ;;  %p903_p0 = pnand %p564_p13, %p870_p4  ;;  %s216_s12 = int_to_ptr.vmem [resolvable:$true] %s215_s12 }
  0x1a   : > { %p529_p1 = scmp.ge.s32.totalorder %s794_s20, 1  ;;  %p241_p2 = scmp.lt.s32.totalorder %s794_s20, 3 }
  0x1b   : > { %s203_s14 = scalar_lea.sflag [#allocation3], %s894_s5  ;;  %p625_p3 = pneg %p903_p0 }
  0x1c   : > { %s636_s21 = scalar_lea.vmem %s216_s12, 128  ;;  %s796_s22 = smov [#allocation2]  }
  0x1d   : > { %p637_p5 = scmp.ne.s32.totalorder %s216_s12, %s636_s21  ;;  %s641_s24 = sshll.u32 %s796_s22, 4  ;;  %s642_s24 = int_to_ptr.vmem [resolvable:$false] %s641_s24 }
  0x1e   : > { %s213_s10 = scalar_lea.hbm %s1048_s0, %s540_s7  ;;  %s643_s25 = scalar_lea.vmem %s642_s24, 256 }
  0x1f   : > { %p639_p6 = pnand %p637_p5, %p625_p3  ;;  %p644_p4 = scmp.lt.s32.totalorder %s216_s12, %s642_s24 }
  0x20   : > { %p645_p10 = scmp.lt.s32.totalorder %s643_s25, %s636_s21 }
  0x21   : > { %p640_p7 = pneg %p639_p6 }
  0x22   : > { %p646_p13 = por %p645_p10, %p644_p4 }
  0x24   : > { %p647_p12 = pnand %p646_p13, %p640_p7 }
  0x26   : > { %650 = shalt.err (!%p647_p12)
}
  0x27   : > { %553 = dma.hbm_to_vmem [thread:$0]  (!%p903_p0), %s213_s10, 128, %s216_s12, %s203_s14  }
  0x28   : > { %p921_p5 = pnand %p529_p1, %p241_p2  ;;  %s417_s11 = scalar_lea.hbm %s1039_s1, %s540_s7 }
  0x29   : > { %s226_s21 = scalar_lea.vmem [#allocation5], %s523_s6  ;;  %s418_s24 = scalar_lea.hbm %s417_s11, 128 }
  0x2a   : > { %s236_s22 = sshll.u32 %s226_s21, 4  ;;  %s223_s25 = scalar_lea.sflag [#allocation6], %s894_s5  ;;  %s237_s22 = int_to_ptr.vmem [resolvable:$true] %s236_s22 }
  0x2b   : > { %s664_s0 = scalar_lea.vmem %s237_s22, 128  ;;  %s797_s10 = smov [#allocation5]  }
  0x2c   : > { %p665_p12 = scmp.ne.s32.totalorder %s237_s22, %s664_s0  ;;  %s669_s12 = sshll.u32 %s797_s10, 4  ;;  %s670_s12 = int_to_ptr.vmem [resolvable:$false] %s669_s12 }
  0x2d   : > { %s671_s14 = scalar_lea.vmem %s670_s12, 256  ;;  %p672_p1 = scmp.lt.s32.totalorder %s237_s22, %s670_s12 }
  0x2e   : > { %p667_p6 = pnand %p665_p12, %p625_p3  ;;  %p673_p2 = scmp.lt.s32.totalorder %s671_s14, %s664_s0 }
  0x30   : > { %p668_p7 = pneg %p667_p6  ;;  %p674_p4 = por %p673_p2, %p672_p1 }
  0x32   : > { %p675_p10 = pnand %p674_p4, %p668_p7 }
  0x34   : > { %678 = shalt.err (!%p675_p10)
}
  0x35   : > { %556 = dma.hbm_to_vmem [thread:$0]  (!%p903_p0), %s418_s24, 128, %s237_s22, %s223_s25  }
  0x36   : > { %245 = sbr.rel (%p921_p5) target bundleno = 228 (0xe4), region = 32  ;;  %s937_s5 = sand.u32 (!%p921_p5), 1, %s778_s16  }
  0x37   : > { %s940_s6 = sshll.u32 (!%p921_p5), %s937_s5, 3  ;;  %s248_s7 = scalar_lea.sflag (!%p921_p5), [#allocation3], %s937_s5 }
  0x38   : > { %s251_s0 = scalar_lea.vmem (!%p921_p5), [#allocation2], %s940_s6 }
  0x3b   : > { %757 = dma.done.wait (%p876_p8), %s248_s7, 128  }
  0x3c   : > { %759 = vsyncadd (%p876_p8), %s248_s7, 4294967168  ;;  %s257_s13 = scalar_lea.sflag [#allocation6], %s937_s5  ;;  %s260_s26 = scalar_lea.vmem [#allocation5], %s940_s6 }
  0x3d   : > { %761 = dma.done.wait (%p876_p8), %s257_s13, 128  }
  0x3e   : > { %763 = vsyncadd (%p876_p8), %s257_s13, 4294967168  ;;  %v798_v0 = vmov 0   ;;  %v799_v1 = vmov 1   ;;  %v303_v2 = vld [vmem:[%s1040_s2] sm:$0xff]  ;;  %v800_v3 = vmov 2   ;;  %v801_v4 = vmov 3  }
  0x3f   : > { %618 = vset.pattern.permute.xlu0 %v798_v0  ;;  %620 = vset.pattern.permute.xlu1 %v799_v1  ;;  %v304_v5 = vld [vmem:[%s251_s0] sm:$0xff]  ;;  %s536_s27 = sshll.u32 %s786_s18, 7  ;;  %s291_s11 = scalar_lea.vmem [#allocation7], %s940_s6  ;;  %v305_v10 = vld [vmem:[%s260_s26] sm:$0xff] }
  0x40   : > { %308 = vperm.xlu0 %618, %v303_v2   ;;  %313 = vperm.xlu1 %620, %v303_v2   ;;  %s349_s21 = sshll.u32 %s291_s11, 4  ;;  %s964_s25 = scalar_lea.hbm %s1041_s3, %s536_s27  ;;  %s966_s21 = int_to_ptr.vmem [resolvable:$true] %s349_s21 }
  0x41   : > { %s298_s10 = scalar_lea.vmem [#allocation8], %s940_s6  ;;  %s330_s14 = scalar_lea.sflag [#allocation4], %s937_s5 }
  0x42   : > { %s971_s12 = sshll.u32 %s298_s10, 4  ;;  %s680_s7 = scalar_lea.vmem %s966_s21, 128  ;;  %s364_s12 = int_to_ptr.vmem [resolvable:$true] %s971_s12 }
  0x43   : > { %p681_p8 = scmp.ne.s32.totalorder %s966_s21, %s680_s7  ;;  %s802_s0 = smov [#allocation7]  }
  0x44   : > { %619 = vset.pattern.permute.xlu0 %v800_v3  ;;  %621 = vset.pattern.permute.xlu1 %v801_v4  ;;  %s684_s13 = sshll.u32 %s802_s0, 4  ;;  %s685_s13 = int_to_ptr.vmem [resolvable:$false] %s684_s13 }
  0x45   : > { %319 = vperm.xlu0 %619, %v303_v2   ;;  %324 = vperm.xlu1 %621, %v303_v2   ;;  %p682_p0 = pnand %p681_p8, %p880_p9  ;;  %s686_s26 = scalar_lea.vmem %s685_s13, 256 }
  0x46   : > { %p687_p13 = scmp.lt.s32.totalorder %s966_s21, %s685_s13  ;;  %p688_p5 = scmp.lt.s32.totalorder %s686_s26, %s680_s7 }
  0x47   : > { %p683_p3 = pneg %p682_p0 }
  0x48   : > { %p689_p12 = por %p688_p5, %p687_p13 }
  0x49   : > { %622 = vset.pattern.permute.xlu0 %v801_v4 }
  0x4a   : > { %p690_p6 = pnand %p689_p12, %p683_p3 }
  0xbb   : > { %v309_v6 = vpop.permute.xlu0 %308  ;;  %v314_v7 = vpop.permute.xlu1 %313 }
  0xbc   : > { %v311_v8 = vmul.f32 %v309_v6, %v304_v5 }
  0xbe   : > { %v316_v9 = vadd.f32 %v314_v7, %v311_v8 }
  0xc0   : > { %317 = vst [vmem:[%s291_s11] sm:$0xff] %v316_v9  ;;  %v320_v11 = vpop.permute.xlu0 %319  ;;  %v325_v12 = vpop.permute.xlu1 %324 }
  0xc1   : > { %v322_v13 = vmul.f32 %v320_v11, %v305_v10 }
  0xc2   : > { %693 = shalt.err (!%p690_p6)
}
  0xc3   : > { %s694_s8 = scalar_lea.hbm %s964_s25, 128  ;;  %s698_s22 = scalar_lea.hbm %s1041_s3, 256 }
  0xc4   : > { %p695_p7 = scmp.ne.s32.totalorder %s964_s25, %s694_s8  ;;  %p699_p4 = scmp.lt.s32.totalorder %s964_s25, %s1041_s3 }
  0xc5   : > { %p700_p10 = scmp.lt.s32.totalorder %s698_s22, %s694_s8 }
  0xc6   : > { %p696_p1 = pnand %p695_p7, %p880_p9 }
  0xc7   : > { %p701_p8 = por %p700_p10, %p699_p4 }
  0xc8   : > { %p697_p2 = pneg %p696_p1 }
  0xca   : > { %p702_p0 = pnand %p701_p8, %p697_p2 }
  0xcc   : > { %705 = shalt.err (!%p702_p0)
}
  0xcd   : > { %546 = dma.vmem_to_hbm [thread:$0]  (%p880_p9), %s966_s21, 128, %s964_s25, %s330_s14   ;;  %v327_v14 = vadd.f32 %v325_v12, %v322_v13 }
  0xce   : > { %s361_s26 = scalar_lea.hbm %s1042_s4, %s536_s27  ;;  %s335_s8 = scalar_lea.sflag [#allocation9], %s937_s5 }
  0xcf   : > { %328 = vst [vmem:[%s298_s10] sm:$0xff] %v327_v14  ;;  %s706_s9 = scalar_lea.vmem %s364_s12, 128  ;;  %s803_s11 = smov [#allocation8]  }
  0xd0   : > { %p707_p3 = scmp.ne.s32.totalorder %s364_s12, %s706_s9  ;;  %s710_s22 = sshll.u32 %s803_s11, 4  ;;  %s711_s22 = int_to_ptr.vmem [resolvable:$false] %s710_s22 }
  0xd1   : > { %s712_s24 = scalar_lea.vmem %s711_s22, 256  ;;  %p713_p12 = scmp.lt.s32.totalorder %s364_s12, %s711_s22 }
  0xd2   : > { %p708_p13 = pnand %p707_p3, %p880_p9  ;;  %p714_p6 = scmp.lt.s32.totalorder %s712_s24, %s706_s9 }
  0xd4   : > { %p709_p5 = pneg %p708_p13  ;;  %p715_p7 = por %p714_p6, %p713_p12 }
  0xd6   : > { %p716_p1 = pnand %p715_p7, %p709_p5 }
  0xd8   : > { %719 = shalt.err (!%p716_p1)
}
  0xd9   : > { %s720_s18 = scalar_lea.hbm %s361_s26, 128  ;;  %s724_s27 = scalar_lea.hbm %s1042_s4, 256 }
  0xda   : > { %p721_p2 = scmp.ne.s32.totalorder %s361_s26, %s720_s18  ;;  %p725_p8 = scmp.lt.s32.totalorder %s361_s26, %s1042_s4 }
  0xdb   : > { %p726_p0 = scmp.lt.s32.totalorder %s724_s27, %s720_s18 }
  0xdc   : > { %p722_p4 = pnand %p721_p2, %p880_p9 }
  0xdd   : > { %p727_p3 = por %p726_p0, %p725_p8 }
  0xde   : > { %p723_p10 = pneg %p722_p4 }
  0xe0   : > { %p728_p13 = pnand %p727_p3, %p723_p10 }
  0xe2   : > { %731 = shalt.err (!%p728_p13)
}
  0xe3   : > { %547 = dma.vmem_to_hbm [thread:$0]  (%p880_p9), %s364_s12, 128, %s361_s26, %s335_s8  }
  0xe4 PF: > { %s375_s10 = sand.u32 1, %s774_s15   ;;  %p1051_p5 = scmp.ge.s32.totalorder %s794_s20, 2 }
  0xe5   : > { %s376_s14 = scalar_lea.sflag [#allocation4], %s375_s10 }
  0xe6   : > { %p558_p12 = pnand %p1051_p5, %p887_p11 }
  0xe8   : > { %p559_p6 = pneg %p558_p12 }
  0xea   : > { %765 = dma.done.wait (%p559_p6), %s376_s14, 128  }
  0xeb   : > { %767 = vsyncadd (%p559_p6), %s376_s14, 4294967168  ;;  %s385_s0 = scalar_lea.sflag [#allocation9], %s375_s10 }
  0xec   : > { %769 = dma.done.wait (%p559_p6), %s385_s0, 128  }
  0xed   : > { %771 = vsyncadd (%p559_p6), %s385_s0, 4294967168  ;;  %s27_s20 = sadd.s32 1, %s794_s20   ;;  %s1052_s15 = smov %s778_s16 }
  0xee   : > { %p24_p7 = scmp.ge.s32.totalorder %s27_s20, 4   ;;  %s1053_s16 = smov %s782_s17 }
  0xef   : > { %s1054_s17 = smov %s885_s29  ;;  %s1055_s18 = smov %s790_s19 }
  0xf0   : > { %s1056_s19 = smov %s1058_s23  ;;  %26 = sbr.rel (!%p24_p7) target bundleno = 12 (0xc), region = 110 }
  0xf5   :  { %390 = vsyncpa [#allocation3], 1 }
  0xf6   :  { %392 = vsyncpa [#allocation3 + $0x1], 1 }
  0xf7   :  { %393 = vsyncpa [#allocation6], 1 }
  0xf8   :  { %395 = vsyncpa [#allocation6 + $0x1], 1 }
  0xf9   :  { %396 = vsyncpa [#allocation4], 1 }
  0xfa   :  { %398 = vsyncpa [#allocation4 + $0x1], 1 }
  0xfb   :  { %399 = vsyncpa [#allocation9], 1 }
  0xfc   :  { %401 = vsyncpa [#allocation9 + $0x1], 1 }

</bundles_post_ra>
